<compile_context>
chip_gen: v7x
topology: tpu7x:2x2x1
jax: 0.10.0
libtpu: 0.0.40
codegen_flags: <defaults>
</compile_context>

<pallas_src>
import jax
import jax.numpy as jnp
from jax.experimental import pallas as pl
from jax.experimental.pallas import tpu as pltpu

LANE = 128      # vreg lane width
SUBLANE = 8     # f32 sublane count


def _round_up(x, m):
    return ((x + m - 1) // m) * m


def _pad2(a, rows, cols):
    r, c = a.shape
    return jnp.pad(a, ((0, rows - r), (0, cols - c)))


def mlp2_kernel(x_ref, w1_ref, b1_ref, w2_ref, b2_ref,
                w3_ref, b3_ref, w4_ref, b4_ref, o_ref):
    # dtype policy lives in the wrapper: x / weights arrive already in the
    # compute dtype (f32 or bf16).  Every matmul accumulates in f32 on the MXU;
    # f32 biases are added to the f32 accumulator; activations are cast back to
    # the compute dtype (no-op for f32) before feeding the next matmul.
    h = jnp.dot(x_ref[...], w1_ref[...],
                preferred_element_type=jnp.float32) + b1_ref[...]
    h = jnp.maximum(h, 0.0).astype(w2_ref.dtype)

    h = jnp.dot(h, w2_ref[...],
                preferred_element_type=jnp.float32) + b2_ref[...]
    h = jnp.maximum(h, 0.0).astype(w3_ref.dtype)

    h = jnp.dot(h, w3_ref[...],
                preferred_element_type=jnp.float32) + b3_ref[...]
    h = jnp.maximum(h, 0.0).astype(w4_ref.dtype)

    out = jnp.dot(h, w4_ref[...],
                  preferred_element_type=jnp.float32) + b4_ref[...]
    o_ref[...] = out.astype(o_ref.dtype)


def mlp2_forward(x, params, *, batch_tile=None, compute_dtype=jnp.float32):
    """Fused MLP2 forward pass.

    x: (B, D_in); params: w1..w4 stored (in_features, out_features) (= PyTorch
    W.T) and b1..b4 stored (1, out_features).  Returns (B, num_classes) in
    x.dtype.
    """
    B, d_in = x.shape
    hidden = params["w1"].shape[1]
    num_classes = params["w4"].shape[1]
    out_dtype = x.dtype

    # ---- lane-dense padded feature dims (K/N multiples of 128) -------------
    Dp = _round_up(d_in, LANE)
    Hp = _round_up(hidden, LANE)
    Cp = _round_up(num_classes, LANE)

    # ---- batch tiling policy: multiple of 8 sublanes, >=2 grid steps when
    #      the batch allows it (v7x has 2 TensorCores to shard "parallel" over)
    if batch_tile is None:
        Bp8 = _round_up(B, SUBLANE)
        batch_tile = min(256, Bp8)
        if Bp8 // batch_tile < 2 and Bp8 % (2 * SUBLANE) == 0:
            batch_tile = Bp8 // 2
    Bp = _round_up(B, batch_tile)
    grid = (Bp // batch_tile,)

    # ---- one-time pad + cast.  Zero padding is exact: padded input columns /
    #      hidden units carry zero weight and zero bias, so they contribute
    #      nothing through Linear+ReLU; padded logit lanes are sliced off. ----
    x_p = _pad2(x, Bp, Dp).astype(compute_dtype)
    w1 = _pad2(params["w1"], Dp, Hp).astype(compute_dtype)
    w2 = _pad2(params["w2"], Hp, Hp).astype(compute_dtype)
    w3 = _pad2(params["w3"], Hp, Hp).astype(compute_dtype)
    w4 = _pad2(params["w4"], Hp, Cp).astype(compute_dtype)
    b1 = _pad2(params["b1"], 1, Hp).astype(jnp.float32)
    b2 = _pad2(params["b2"], 1, Hp).astype(jnp.float32)
    b3 = _pad2(params["b3"], 1, Hp).astype(jnp.float32)
    b4 = _pad2(params["b4"], 1, Cp).astype(jnp.float32)

    # Weights/biases are constant-indexed across the batch grid (resident in
    # VMEM).  At much larger hidden sizes, add pipeline_mode=pl.Buffered(1)
    # here (and a K/N "arbitrary" grid axis) to fit v7x's 64 MiB VMEM; at these
    # sizes the second pipeline buffer is negligible.
    def full_spec(shape):
        return pl.BlockSpec(shape, lambda i: (0,) * len(shape))

    in_specs = [
        pl.BlockSpec((batch_tile, Dp), lambda i: (i, 0)),   # x: tiled on batch
        full_spec(w1.shape), full_spec(b1.shape),
        full_spec(w2.shape), full_spec(b2.shape),
        full_spec(w3.shape), full_spec(b3.shape),
        full_spec(w4.shape), full_spec(b4.shape),
    ]
    out_spec = pl.BlockSpec((batch_tile, Cp), lambda i: (i, 0))

    # ---- VMEM budget with headroom (v7x: 64 MiB physical, 32 MiB scoped
    #      default; v5e scoped default is only 16 MiB) -----------------------
    cbytes = jnp.dtype(compute_dtype).itemsize
    obytes = jnp.dtype(out_dtype).itemsize
    weight_bytes = (Dp * Hp + 2 * Hp * Hp + Hp * Cp) * cbytes + (3 * Hp + Cp) * 4
    tile_bytes = batch_tile * Dp * cbytes + batch_tile * Cp * obytes
    vmem_limit = 2 * (weight_bytes + tile_bytes) + (8 << 20)  # 2x: double buffers
    vmem_limit = max(16 << 20, min(vmem_limit, 48 << 20))

    flops = 2 * B * hidden * (d_in + 2 * hidden + num_classes)
    bytes_accessed = x_p.size * cbytes + weight_bytes + Bp * Cp * obytes

    out_padded = pl.pallas_call(
        mlp2_kernel,
        out_shape=jax.ShapeDtypeStruct((Bp, Cp), out_dtype),
        grid_spec=pltpu.PrefetchScalarGridSpec(
            num_scalar_prefetch=0,
            grid=grid,
            in_specs=in_specs,
            out_specs=out_spec,
        ),
        compiler_params=pltpu.CompilerParams(
            dimension_semantics=("parallel",),
            vmem_limit_bytes=int(vmem_limit),
        ),
        cost_estimate=pl.CostEstimate(
            flops=int(flops),
            transcendentals=0,
            bytes_accessed=int(bytes_accessed),
        ),
    )(x_p, w1, b1, w2, b2, w3, b3, w4, b4)

    # Drop batch padding and padded logit lanes.
    return out_padded[:B, :num_classes]


def init_params(key, input_size, hidden_size, num_classes):
    """Deterministic init matching MLP2.__init__ shapes; weights stored
    (in_features, out_features) (= PyTorch W.T), biases (1, out_features)."""
    dims = [(input_size, hidden_size),
            (hidden_size, hidden_size),
            (hidden_size, hidden_size),
            (hidden_size, num_classes)]
    params = {}
    for idx, (din, dout) in enumerate(dims, start=1):
        key, kw, kb = jax.random.split(key, 3)
        bound = 1.0 / jnp.sqrt(din)   # mimic nn.Linear uniform init
        params[f"w{idx}"] = jax.random.uniform(
            kw, (din, dout), jnp.float32, minval=-bound, maxval=bound)
        params[f"b{idx}"] = jax.random.uniform(
            kb, (1, dout), jnp.float32, minval=-bound, maxval=bound)
    return params


def mlp2_reference(x, params):
    h = jnp.maximum(x @ params["w1"] + params["b1"], 0.0)
    h = jnp.maximum(h @ params["w2"] + params["b2"], 0.0)
    h = jnp.maximum(h @ params["w3"] + params["b3"], 0.0)
    return h @ params["w4"] + params["b4"]


if __name__ == "__main__":
    input_size, hidden_size, num_classes = 32, 32, 10
    batch = 8

    key = jax.random.PRNGKey(0)
    key, kx = jax.random.split(key)
    x = jax.random.normal(kx, (batch, input_size), jnp.float32)
    params = init_params(key, input_size, hidden_size, num_classes)

    ref = mlp2_reference(x, params)

    # f32 MXU-input path (tight check).
    out_f32 = jax.block_until_ready(
        mlp2_forward(x, params, compute_dtype=jnp.float32))
    assert out_f32.shape == (batch, num_classes)
    assert jnp.allclose(out_f32, ref, atol=2e-5, rtol=2e-5)

    # bf16 MXU-input / f32-accumulate path (fast path on v6e/v7x).
    out_bf16 = jax.block_until_ready(
        mlp2_forward(x, params, compute_dtype=jnp.bfloat16))
    assert out_bf16.shape == (batch, num_classes)
    assert jnp.allclose(out_bf16.astype(jnp.float32), ref, atol=1e-1, rtol=1e-1)

    print("KERNEL_OK")
</pallas_src>

<mosaic_0001>
module attributes {stable_mosaic.version = 11 : i64} {
  func.func @mlp2_kernel(%arg0: i32, %arg1: memref<8x128xf32, #tpu.memory_space<vmem>>, %arg2: memref<128x128xf32, #tpu.memory_space<vmem>>, %arg3: memref<1x128xf32, #tpu.memory_space<vmem>>, %arg4: memref<128x128xf32, #tpu.memory_space<vmem>>, %arg5: memref<1x128xf32, #tpu.memory_space<vmem>>, %arg6: memref<128x128xf32, #tpu.memory_space<vmem>>, %arg7: memref<1x128xf32, #tpu.memory_space<vmem>>, %arg8: memref<128x128xf32, #tpu.memory_space<vmem>>, %arg9: memref<1x128xf32, #tpu.memory_space<vmem>>, %arg10: memref<8x128xf32, #tpu.memory_space<vmem>>) attributes {dimension_semantics = [#tpu.dimension_semantics<parallel>], iteration_bounds = array<i64: 1>, scalar_prefetch = 0 : i64, scratch_operands = 0 : i64, tpu.core_type = #tpu.core_type<tc>, window_params = [{transform_indices = @transform_0, window_bounds = array<i64: 8, 128>}, {pipeline_mode = #tpu.pipeline_mode<synchronous>, transform_indices = @transform_1, window_bounds = array<i64: 128, 128>}, {pipeline_mode = #tpu.pipeline_mode<synchronous>, transform_indices = @transform_2, window_bounds = array<i64: 1, 128>}, {pipeline_mode = #tpu.pipeline_mode<synchronous>, transform_indices = @transform_3, window_bounds = array<i64: 128, 128>}, {pipeline_mode = #tpu.pipeline_mode<synchronous>, transform_indices = @transform_4, window_bounds = array<i64: 1, 128>}, {pipeline_mode = #tpu.pipeline_mode<synchronous>, transform_indices = @transform_5, window_bounds = array<i64: 128, 128>}, {pipeline_mode = #tpu.pipeline_mode<synchronous>, transform_indices = @transform_6, window_bounds = array<i64: 1, 128>}, {pipeline_mode = #tpu.pipeline_mode<synchronous>, transform_indices = @transform_7, window_bounds = array<i64: 128, 128>}, {pipeline_mode = #tpu.pipeline_mode<synchronous>, transform_indices = @transform_8, window_bounds = array<i64: 1, 128>}, {transform_indices = @transform_9, window_bounds = array<i64: 8, 128>}]} {
    %c0 = arith.constant 0 : index
    %c0_0 = arith.constant 0 : index
    %0 = vector.load %arg1[%c0, %c0_0] : memref<8x128xf32, #tpu.memory_space<vmem>>, vector<8x128xf32>
    %c0_1 = arith.constant 0 : index
    %c0_2 = arith.constant 0 : index
    %1 = vector.load %arg2[%c0_1, %c0_2] : memref<128x128xf32, #tpu.memory_space<vmem>>, vector<128x128xf32>
    %cst = arith.constant dense<0.000000e+00> : vector<8x128xf32>
    %2 = tpu.matmul %0, %1, %cst {dimension_numbers = #tpu.dot_dimension_numbers<[1], [0], [0], [1], [0, 0, 1, 1], [], []>} : vector<8x128xf32>, vector<128x128xf32>, vector<8x128xf32> -> vector<8x128xf32>
    %c0_3 = arith.constant 0 : index
    %c0_4 = arith.constant 0 : index
    %3 = vector.load %arg3[%c0_3, %c0_4] : memref<1x128xf32, #tpu.memory_space<vmem>>, vector<1x128xf32>
    %4 = vector.broadcast %3 : vector<1x128xf32> to vector<8x128xf32>
    %5 = arith.addf %2, %4 : vector<8x128xf32>
    %cst_5 = arith.constant 0.000000e+00 : f32
    %6 = vector.broadcast %cst_5 : f32 to vector<8x128xf32>
    %7 = arith.maximumf %5, %6 : vector<8x128xf32>
    %c0_6 = arith.constant 0 : index
    %c0_7 = arith.constant 0 : index
    %8 = vector.load %arg4[%c0_6, %c0_7] : memref<128x128xf32, #tpu.memory_space<vmem>>, vector<128x128xf32>
    %cst_8 = arith.constant dense<0.000000e+00> : vector<8x128xf32>
    %9 = tpu.matmul %7, %8, %cst_8 {dimension_numbers = #tpu.dot_dimension_numbers<[1], [0], [0], [1], [0, 0, 1, 1], [], []>} : vector<8x128xf32>, vector<128x128xf32>, vector<8x128xf32> -> vector<8x128xf32>
    %c0_9 = arith.constant 0 : index
    %c0_10 = arith.constant 0 : index
    %10 = vector.load %arg5[%c0_9, %c0_10] : memref<1x128xf32, #tpu.memory_space<vmem>>, vector<1x128xf32>
    %11 = vector.broadcast %10 : vector<1x128xf32> to vector<8x128xf32>
    %12 = arith.addf %9, %11 : vector<8x128xf32>
    %cst_11 = arith.constant 0.000000e+00 : f32
    %13 = vector.broadcast %cst_11 : f32 to vector<8x128xf32>
    %14 = arith.maximumf %12, %13 : vector<8x128xf32>
    %c0_12 = arith.constant 0 : index
    %c0_13 = arith.constant 0 : index
    %15 = vector.load %arg6[%c0_12, %c0_13] : memref<128x128xf32, #tpu.memory_space<vmem>>, vector<128x128xf32>
    %cst_14 = arith.constant dense<0.000000e+00> : vector<8x128xf32>
    %16 = tpu.matmul %14, %15, %cst_14 {dimension_numbers = #tpu.dot_dimension_numbers<[1], [0], [0], [1], [0, 0, 1, 1], [], []>} : vector<8x128xf32>, vector<128x128xf32>, vector<8x128xf32> -> vector<8x128xf32>
    %c0_15 = arith.constant 0 : index
    %c0_16 = arith.constant 0 : index
    %17 = vector.load %arg7[%c0_15, %c0_16] : memref<1x128xf32, #tpu.memory_space<vmem>>, vector<1x128xf32>
    %18 = vector.broadcast %17 : vector<1x128xf32> to vector<8x128xf32>
    %19 = arith.addf %16, %18 : vector<8x128xf32>
    %cst_17 = arith.constant 0.000000e+00 : f32
    %20 = vector.broadcast %cst_17 : f32 to vector<8x128xf32>
    %21 = arith.maximumf %19, %20 : vector<8x128xf32>
    %c0_18 = arith.constant 0 : index
    %c0_19 = arith.constant 0 : index
    %22 = vector.load %arg8[%c0_18, %c0_19] : memref<128x128xf32, #tpu.memory_space<vmem>>, vector<128x128xf32>
    %cst_20 = arith.constant dense<0.000000e+00> : vector<8x128xf32>
    %23 = tpu.matmul %21, %22, %cst_20 {dimension_numbers = #tpu.dot_dimension_numbers<[1], [0], [0], [1], [0, 0, 1, 1], [], []>} : vector<8x128xf32>, vector<128x128xf32>, vector<8x128xf32> -> vector<8x128xf32>
    %c0_21 = arith.constant 0 : index
    %c0_22 = arith.constant 0 : index
    %24 = vector.load %arg9[%c0_21, %c0_22] : memref<1x128xf32, #tpu.memory_space<vmem>>, vector<1x128xf32>
    %25 = vector.broadcast %24 : vector<1x128xf32> to vector<8x128xf32>
    %26 = arith.addf %23, %25 : vector<8x128xf32>
    %c0_23 = arith.constant 0 : index
    %c0_24 = arith.constant 0 : index
    %27 = vector.load %arg10[%c0_23, %c0_24] : memref<8x128xf32, #tpu.memory_space<vmem>>, vector<8x128xf32>
    tpu.vector_store %arg10[%c0_23, %c0_24], %26 {strides = array<i32>} : memref<8x128xf32, #tpu.memory_space<vmem>>, vector<8x128xf32>,
    return
  }
  func.func @transform_0(%arg0: i32) -> (i32, i32) {
    %c0_i32 = arith.constant 0 : i32
    %c0_i32_0 = arith.constant 0 : i32
    return %arg0, %c0_i32 : i32, i32
  }
  func.func @transform_1(%arg0: i32) -> (i32, i32) {
    %c0_i32 = arith.constant 0 : i32
    %c0_i32_0 = arith.constant 0 : i32
    %c0_i32_1 = arith.constant 0 : i32
    return %c0_i32, %c0_i32_0 : i32, i32
  }
  func.func @transform_2(%arg0: i32) -> (i32, i32) {
    %c0_i32 = arith.constant 0 : i32
    %c0_i32_0 = arith.constant 0 : i32
    %c0_i32_1 = arith.constant 0 : i32
    return %c0_i32, %c0_i32_0 : i32, i32
  }
  func.func @transform_3(%arg0: i32) -> (i32, i32) {
    %c0_i32 = arith.constant 0 : i32
    %c0_i32_0 = arith.constant 0 : i32
    %c0_i32_1 = arith.constant 0 : i32
    return %c0_i32, %c0_i32_0 : i32, i32
  }
  func.func @transform_4(%arg0: i32) -> (i32, i32) {
    %c0_i32 = arith.constant 0 : i32
    %c0_i32_0 = arith.constant 0 : i32
    %c0_i32_1 = arith.constant 0 : i32
    return %c0_i32, %c0_i32_0 : i32, i32
  }
  func.func @transform_5(%arg0: i32) -> (i32, i32) {
    %c0_i32 = arith.constant 0 : i32
    %c0_i32_0 = arith.constant 0 : i32
    %c0_i32_1 = arith.constant 0 : i32
    return %c0_i32, %c0_i32_0 : i32, i32
  }
  func.func @transform_6(%arg0: i32) -> (i32, i32) {
    %c0_i32 = arith.constant 0 : i32
    %c0_i32_0 = arith.constant 0 : i32
    %c0_i32_1 = arith.constant 0 : i32
    return %c0_i32, %c0_i32_0 : i32, i32
  }
  func.func @transform_7(%arg0: i32) -> (i32, i32) {
    %c0_i32 = arith.constant 0 : i32
    %c0_i32_0 = arith.constant 0 : i32
    %c0_i32_1 = arith.constant 0 : i32
    return %c0_i32, %c0_i32_0 : i32, i32
  }
  func.func @transform_8(%arg0: i32) -> (i32, i32) {
    %c0_i32 = arith.constant 0 : i32
    %c0_i32_0 = arith.constant 0 : i32
    %c0_i32_1 = arith.constant 0 : i32
    return %c0_i32, %c0_i32_0 : i32, i32
  }
  func.func @transform_9(%arg0: i32) -> (i32, i32) {
    %c0_i32 = arith.constant 0 : i32
    %c0_i32_0 = arith.constant 0 : i32
    return %arg0, %c0_i32 : i32, i32
  }
}

</mosaic_0001>

<bundles_post_ra>
// kernel: tpu_custom_call.1
= control target key start
LH: loop header
LB: loop body
LE: loop exit
PB: predicated region body
PF: predicated region fallthrough
CT: control target
= control target key end

     0   :  { %14 = vsyncpa [#allocation3], 0  ;;  %s1149_s0 = inlined_call_operand.hbm [shape: f32[8,128], index: 0, kind: input, shape index: {}]   ;;  %s1150_s1 = inlined_call_operand.hbm [shape: f32[128,128], index: 1, kind: input, shape index: {}]   ;;  %s1151_s2 = inlined_call_operand.vmem [shape: f32[1,128], index: 2, kind: input, shape index: {}]   ;;  %s1152_s3 = inlined_call_operand.hbm [shape: f32[128,128], index: 3, kind: input, shape index: {}]   ;;  %s1153_s4 = inlined_call_operand.vmem [shape: f32[1,128], index: 4, kind: input, shape index: {}]   ;;  %s1154_s5 = inlined_call_operand.hbm [shape: f32[128,128], index: 5, kind: input, shape index: {}]   ;;  %s1155_s6 = inlined_call_operand.vmem [shape: f32[1,128], index: 6, kind: input, shape index: {}]   ;;  %s1156_s7 = inlined_call_operand.hbm [shape: f32[128,128], index: 7, kind: input, shape index: {}]   ;;  %s1157_s8 = inlined_call_operand.vmem [shape: f32[1,128], index: 8, kind: input, shape index: {}]   ;;  %s1158_s9 = inlined_call_operand.hbm [shape: f32[8,128], index: 9, kind: output, shape index: {}]  }
   0x1   :  { %15 = vsyncpa [#allocation6], 0 }
   0x2   :  { %16 = vsyncpa [#allocation9], 0 }
   0x3   :  { %17 = vsyncpa [#allocation4], 0  ;;  %s952_s30 = smov [#allocation5]   ;;  %s812_s13 = scalar_lea.hbm %s1150_s1, 2048 }
   0x4   :  { %s33_s10 = sshll.u32 %s952_s30, 4  ;;  %p813_p0 = scmp.ne.s32.totalorder %s1150_s1, %s812_s13  ;;  %s34_s10 = int_to_ptr.vmem [resolvable:$true] %s33_s10 }
   0x5   :  { %p816_p1 = scmp.lt.u32.totalorder %s812_s13, %s1150_s1 }
   0x7   :  { %p818_p2 = pnand %p816_p1, %p813_p0 }
   0x9   :  { %821 = shalt.err (!%p818_p2)
}
   0xa   :  { %s822_s18 = scalar_lea.vmem %s34_s10, 2048  ;;  %p827_p4 = scmp.lt.s32.totalorder %s34_s10, %s34_s10 }
   0xb   :  { %p823_p3 = scmp.ne.s32.totalorder %s34_s10, %s822_s18  ;;  %p828_p5 = scmp.lt.s32.totalorder %s822_s18, %s822_s18 }
   0xd   :  { %p829_p6 = por %p828_p5, %p827_p4 }
   0xf   :  { %p830_p7 = pnand %p829_p6, %p823_p3 }
  0x11   :  { %833 = shalt.err (!%p830_p7)
}
  0x12   :  { %s953_s19 = smov 128   ;;  %s954_s20 = smov 8  }
  0x13   :  { %39 = dma.hbm_to_vmem [thread:$0]  %s1150_s1, 2048, %s34_s10, [#allocation6], %s953_s19, %s953_s19, %s954_s20  }
  0x14   :  { %s955_s23 = smov [#allocation8]   ;;  %s956_s25 = smov [#allocation2]  }
  0x15   :  { %s61_s24 = sshll.u32 %s955_s23, 4  ;;  %s24_s26 = sshll.u32 %s956_s25, 4  ;;  %s62_s24 = int_to_ptr.vmem [resolvable:$true] %s61_s24  ;;  %s25_s26 = int_to_ptr.vmem [resolvable:$true] %s24_s26 }
  0x16   :  { %s834_s29 = scalar_lea.hbm %s1154_s5, 2048 }
  0x17   :  { %p835_p8 = scmp.ne.s32.totalorder %s1154_s5, %s834_s29  ;;  %p838_p9 = scmp.lt.u32.totalorder %s834_s29, %s1154_s5 }
  0x19   :  { %p840_p10 = pnand %p838_p9, %p835_p8 }
  0x1b   :  { %843 = shalt.err (!%p840_p10)
}
  0x1c   :  { %s844_s1 = scalar_lea.vmem %s62_s24, 2048  ;;  %p849_p12 = scmp.lt.s32.totalorder %s62_s24, %s62_s24 }
  0x1d   :  { %p845_p11 = scmp.ne.s32.totalorder %s62_s24, %s844_s1  ;;  %p850_p13 = scmp.lt.s32.totalorder %s844_s1, %s844_s1 }
  0x1f   :  { %p851_p0 = por %p850_p13, %p849_p12 }
  0x21   :  { %p852_p1 = pnand %p851_p0, %p845_p11 }
  0x23   :  { %855 = shalt.err (!%p852_p1)
}
  0x24   :  { %67 = dma.hbm_to_vmem [thread:$0]  %s1154_s5, 2048, %s62_s24, [#allocation9], %s953_s19, %s953_s19, %s954_s20  }
  0x25   :  { %s856_s17 = scalar_lea.hbm %s1149_s0, 128 }
  0x26   :  { %p857_p2 = scmp.ne.s32.totalorder %s1149_s0, %s856_s17  ;;  %p860_p3 = scmp.lt.u32.totalorder %s856_s17, %s1149_s0 }
  0x28   :  { %p862_p4 = pnand %p860_p3, %p857_p2 }
  0x2a   :  { %865 = shalt.err (!%p862_p4)
}
  0x2b   :  { %s866_s25 = scalar_lea.vmem %s25_s26, 128  ;;  %p871_p6 = scmp.lt.s32.totalorder %s25_s26, %s25_s26 }
  0x2c   :  { %p867_p5 = scmp.ne.s32.totalorder %s25_s26, %s866_s25  ;;  %p872_p7 = scmp.lt.s32.totalorder %s866_s25, %s866_s25 }
  0x2e   :  { %p873_p8 = por %p872_p7, %p871_p6 }
  0x30   :  { %p874_p9 = pnand %p873_p8, %p867_p5 }
  0x32   :  { %877 = shalt.err (!%p874_p9)
}
  0x33   :  { %27 = dma.hbm_to_vmem [thread:$0]  %s1149_s0, 128, %s25_s26, [#allocation3]  }
  0x34   :  { %s957_s27 = smov [#allocation7]   ;;  %s958_s29 = smov [#allocation10]  }
  0x35   :  { %s47_s28 = sshll.u32 %s957_s27, 4  ;;  %s75_s30 = sshll.u32 %s958_s29, 4  ;;  %s48_s28 = int_to_ptr.vmem [resolvable:$true] %s47_s28  ;;  %s76_s30 = int_to_ptr.vmem [resolvable:$true] %s75_s30 }
  0x36   :  { %s878_s13 = scalar_lea.hbm %s1152_s3, 2048 }
  0x37   :  { %p879_p10 = scmp.ne.s32.totalorder %s1152_s3, %s878_s13  ;;  %p882_p11 = scmp.lt.u32.totalorder %s878_s13, %s1152_s3 }
  0x39   :  { %p884_p12 = pnand %p882_p11, %p879_p10 }
  0x3b   :  { %887 = shalt.err (!%p884_p12)
}
  0x3c   :  { %s888_s0 = scalar_lea.vmem %s48_s28, 2048  ;;  %p893_p0 = scmp.lt.s32.totalorder %s48_s28, %s48_s28 }
  0x3d   :  { %p889_p13 = scmp.ne.s32.totalorder %s48_s28, %s888_s0  ;;  %p894_p1 = scmp.lt.s32.totalorder %s888_s0, %s888_s0 }
  0x3f   :  { %p895_p2 = por %p894_p1, %p893_p0 }
  0x41   :  { %p896_p3 = pnand %p895_p2, %p889_p13 }
  0x43   :  { %899 = shalt.err (!%p896_p3)
}
  0x44   :  { %53 = dma.hbm_to_vmem [thread:$0]  %s1152_s3, 2048, %s48_s28, [#allocation6], %s953_s19, %s953_s19, %s954_s20  }
  0x45   :  { %s900_s21 = scalar_lea.hbm %s1156_s7, 2048 }
  0x46   :  { %p901_p4 = scmp.ne.s32.totalorder %s1156_s7, %s900_s21  ;;  %p904_p5 = scmp.lt.u32.totalorder %s900_s21, %s1156_s7 }
  0x48   :  { %p906_p6 = pnand %p904_p5, %p901_p4 }
  0x4a   :  { %909 = shalt.err (!%p906_p6)
}
  0x4b   :  { %s910_s24 = scalar_lea.vmem %s76_s30, 2048  ;;  %p915_p8 = scmp.lt.s32.totalorder %s76_s30, %s76_s30 }
  0x4c   :  { %p911_p7 = scmp.ne.s32.totalorder %s76_s30, %s910_s24  ;;  %p916_p9 = scmp.lt.s32.totalorder %s910_s24, %s910_s24 }
  0x4e   :  { %p917_p10 = por %p916_p9, %p915_p8 }
  0x50   :  { %p918_p11 = pnand %p917_p10, %p911_p7 }
  0x52   :  { %921 = shalt.err (!%p918_p11)
}
  0x53   :  { %81 = dma.hbm_to_vmem [thread:$0]  %s1156_s7, 2048, %s76_s30, [#allocation9], %s953_s19, %s953_s19, %s954_s20  }
  0x54   :  { %944 = dma.done.wait [#allocation3], 128  }
  0x55   :  { %945 = vsyncadd [#allocation3], 4294967168 }
  0x56   :  { %946 = dma.done.wait [#allocation6], 4096  }
  0x57   :  { %947 = vsyncadd [#allocation6], 4294963200 }
  0x58   :  { %948 = dma.done.wait [#allocation9], 4096  }
  0x59   :  { %949 = vsyncadd [#allocation9], 4294963200  ;;  %v959_v0 = vmov 0.0|0.0   ;;  %vm960_vm0 = vmmov 0   ;;  %v961_v1 = vmov 0.0   ;;  %v100_v2 = vld [vmem:[#allocation5] sm:$0xff] }
  0x5a   :  { %705 = vmatprep.subr.bf16.mxu0 %v959_v0  ;;  %597 = vmatprep.mubr.msk.f32.mxu0 %vm960_vm0, %v961_v1  ;;  %v101_v3 = vld [vmem:[#allocation5 + $0x8] sm:$0xff]  ;;  %v102_v4 = vld [vmem:[#allocation5 + $0x10] sm:$0xff]  ;;  %v103_v6 = vld [vmem:[#allocation5 + $0x18] sm:$0xff]  ;;  %s962_s11 = smov [#allocation11]  }
  0x5b   :  { %729 = vmatprep.subr.bf16.mxu1 %v959_v0  ;;  %632 = vmatprep.mubr.msk.f32.mxu1 %vm960_vm0, %v961_v1  ;;  %v706_v5 = vpack.c.bf16 %v101_v3, %v100_v2  ;;  %v709_v7 = vpack.c.bf16 %v103_v6, %v102_v4  ;;  %v104_v8 = vld [vmem:[#allocation5 + $0x20] sm:$0xff]  ;;  %v105_v9 = vld [vmem:[#allocation5 + $0x28] sm:$0xff]  ;;  %v196_v12 = vld [vmem:[#allocation7 + $0x10] sm:$0xff]  ;;  %s482_s12 = sshll.u32 %s962_s11, 4  ;;  %s483_s12 = int_to_ptr.vmem [resolvable:$true] %s482_s12 }
  0x5c   :  { %v194_v10 = vld [vmem:[#allocation7] sm:$0xff]  ;;  %v195_v11 = vld [vmem:[#allocation7 + $0x8] sm:$0xff]  ;;  %v197_v13 = vld [vmem:[#allocation7 + $0x18] sm:$0xff]  ;;  %v712_v14 = vpack.c.bf16 %v105_v9, %v104_v8  ;;  %s922_s13 = scalar_lea.vmem %s483_s12, 128  ;;  %p927_p13 = scmp.lt.s32.totalorder %s483_s12, %s483_s12 }
  0x5d   :  { %707 = vmatpush3.bf16.msra.mxu0 %v706_v5  ;;  %v730_v15 = vpack.c.bf16 %v195_v11, %v194_v10  ;;  %v106_v16 = vld [vmem:[#allocation5 + $0x30] sm:$0xff]  ;;  %v107_v17 = vld [vmem:[#allocation5 + $0x38] sm:$0xff]  ;;  %v733_v18 = vpack.c.bf16 %v197_v13, %v196_v12  ;;  %v198_v19 = vld [vmem:[#allocation7 + $0x20] sm:$0xff]  ;;  %p923_p12 = scmp.ne.s32.totalorder %s483_s12, %s922_s13  ;;  %p928_p0 = scmp.lt.s32.totalorder %s922_s13, %s922_s13 }
  0x5e   :  { %708 = vmatprep.subr.bf16.mxu0 %v959_v0  ;;  %v199_v20 = vld [vmem:[#allocation7 + $0x28] sm:$0xff]  ;;  %v715_v21 = vpack.c.bf16 %v107_v17, %v106_v16  ;;  %v108_v22 = vld [vmem:[#allocation5 + $0x40] sm:$0xff]  ;;  %v200_v25 = vld [vmem:[#allocation7 + $0x30] sm:$0xff] }
  0x5f   :  { %731 = vmatpush3.bf16.msra.mxu1 %v730_v15  ;;  %v109_v23 = vld [vmem:[#allocation5 + $0x48] sm:$0xff]  ;;  %v736_v24 = vpack.c.bf16 %v199_v20, %v198_v19  ;;  %v201_v26 = vld [vmem:[#allocation7 + $0x38] sm:$0xff]  ;;  %v110_v28 = vld [vmem:[#allocation5 + $0x50] sm:$0xff]  ;;  %p929_p1 = por %p928_p0, %p927_p13 }
  0x60   :  { %732 = vmatprep.subr.bf16.mxu1 %v959_v0  ;;  %v718_v27 = vpack.c.bf16 %v109_v23, %v108_v22  ;;  %v111_v29 = vld [vmem:[#allocation5 + $0x58] sm:$0xff]  ;;  %v739_v30 = vpack.c.bf16 %v201_v26, %v200_v25  ;;  %v202_v31 = vld [vmem:[#allocation7 + $0x40] sm:$0xff]  ;;  %v203_v32 = vld [vmem:[#allocation7 + $0x48] sm:$0xff] }
  0x61   :  { %710 = vmatpush3.bf16.msra.mxu0 %v709_v7  ;;  %v721_v33 = vpack.c.bf16 %v111_v29, %v110_v28  ;;  %v112_v34 = vld [vmem:[#allocation5 + $0x60] sm:$0xff]  ;;  %v113_v35 = vld [vmem:[#allocation5 + $0x68] sm:$0xff]  ;;  %v742_v36 = vpack.c.bf16 %v203_v32, %v202_v31  ;;  %v204_v37 = vld [vmem:[#allocation7 + $0x50] sm:$0xff]  ;;  %p930_p2 = pnand %p929_p1, %p923_p12 }
  0x62   :  { %711 = vmatprep.subr.bf16.mxu0 %v959_v0  ;;  %v205_v38 = vld [vmem:[#allocation7 + $0x58] sm:$0xff]  ;;  %v724_v39 = vpack.c.bf16 %v113_v35, %v112_v34  ;;  %v114_v40 = vld [vmem:[#allocation5 + $0x70] sm:$0xff]  ;;  %v206_v43 = vld [vmem:[#allocation7 + $0x60] sm:$0xff] }
  0x63   :  { %734 = vmatpush3.bf16.msra.mxu1 %v733_v18  ;;  %v115_v41 = vld [vmem:[#allocation5 + $0x78] sm:$0xff]  ;;  %v745_v42 = vpack.c.bf16 %v205_v38, %v204_v37  ;;  %v207_v44 = vld [vmem:[#allocation7 + $0x68] sm:$0xff]  ;;  %v208_v48 = vld [vmem:[#allocation7 + $0x70] sm:$0xff] }
  0x64   :  { %735 = vmatprep.subr.bf16.mxu1 %v959_v0  ;;  %v727_v45 = vpack.c.bf16 %v115_v41, %v114_v40  ;;  %v748_v46 = vpack.c.bf16 %v207_v44, %v206_v43  ;;  %v99_v47 = vld [vmem:[#allocation2] sm:$0xff]  ;;  %v288_v51 = vld [vmem:[#allocation8] sm:$0xff]  ;;  %v289_v52 = vld [vmem:[#allocation8 + $0x8] sm:$0xff] }
  0x65   :  { %713 = vmatpush3.bf16.msra.mxu0 %v712_v14  ;;  %v209_v49 = vld [vmem:[#allocation7 + $0x78] sm:$0xff]  ;;  %v290_v53 = vld [vmem:[#allocation8 + $0x10] sm:$0xff]  ;;  %v754_v54 = vpack.c.bf16 %v289_v52, %v288_v51  ;;  %v292_v57 = vld [vmem:[#allocation8 + $0x20] sm:$0xff] }
  0x66   :  { %714 = vmatprep.subr.bf16.mxu0 %v959_v0  ;;  %v751_v50 = vpack.c.bf16 %v209_v49, %v208_v48  ;;  %v291_v55 = vld [vmem:[#allocation8 + $0x18] sm:$0xff]  ;;  %v293_v58 = vld [vmem:[#allocation8 + $0x28] sm:$0xff]  ;;  %v294_v60 = vld [vmem:[#allocation8 + $0x30] sm:$0xff] }
  0x67   :  { %737 = vmatpush3.bf16.msra.mxu1 %v736_v24  ;;  %v757_v56 = vpack.c.bf16 %v291_v55, %v290_v53  ;;  %v760_v59 = vpack.c.bf16 %v293_v58, %v292_v57  ;;  %v295_v61 = vld [vmem:[#allocation8 + $0x38] sm:$0xff]  ;;  %v296_v63 = vld [vmem:[#allocation8 + $0x40] sm:$0xff]  ;;  %v297_v2 = vld [vmem:[#allocation8 + $0x48] sm:$0xff] }
  0x68   :  { %738 = vmatprep.subr.bf16.mxu1 %v959_v0  ;;  %v763_v62 = vpack.c.bf16 %v295_v61, %v294_v60  ;;  %v766_v3 = vpack.c.bf16 %v297_v2, %v296_v63  ;;  %v298_v4 = vld [vmem:[#allocation8 + $0x50] sm:$0xff]  ;;  %v299_v5 = vld [vmem:[#allocation8 + $0x58] sm:$0xff]  ;;  %v300_v7 = vld [vmem:[#allocation8 + $0x60] sm:$0xff] }
  0x69   :  { %716 = vmatpush3.bf16.msra.mxu0 %v715_v21  ;;  %v769_v6 = vpack.c.bf16 %v299_v5, %v298_v4  ;;  %v301_v8 = vld [vmem:[#allocation8 + $0x68] sm:$0xff]  ;;  %v493_v10 = vld [vmem:[%s1151_s2] ss:$0 sm:$0xff]  ;;  %v302_v15 = vld [vmem:[#allocation8 + $0x70] sm:$0xff] }
  0x6a   :  { %717 = vmatprep.subr.bf16.mxu0 %v959_v0  ;;  %v772_v9 = vpack.c.bf16 %v301_v8, %v300_v7  ;;  %v303_v16 = vld [vmem:[#allocation8 + $0x78] sm:$0xff]  ;;  %v382_v18 = vld [vmem:[#allocation10] sm:$0xff]  ;;  %v383_v19 = vld [vmem:[#allocation10 + $0x8] sm:$0xff] }
  0x6b   :  { %740 = vmatpush3.bf16.msra.mxu1 %v739_v30  ;;  %v775_v17 = vpack.c.bf16 %v303_v16, %v302_v15  ;;  %v384_v20 = vld [vmem:[#allocation10 + $0x10] sm:$0xff]  ;;  %v778_v21 = vpack.c.bf16 %v383_v19, %v382_v18  ;;  %v385_v22 = vld [vmem:[#allocation10 + $0x18] sm:$0xff]  ;;  %v386_v24 = vld [vmem:[#allocation10 + $0x20] sm:$0xff] }
  0x6c   :  { %741 = vmatprep.subr.bf16.mxu1 %v959_v0  ;;  %v781_v23 = vpack.c.bf16 %v385_v22, %v384_v20  ;;  %v387_v25 = vld [vmem:[#allocation10 + $0x28] sm:$0xff]  ;;  %v390_v29 = vld [vmem:[#allocation10 + $0x40] sm:$0xff]  ;;  %v392_v32 = vld [vmem:[#allocation10 + $0x50] sm:$0xff] }
  0x6d   :  { %719 = vmatpush3.bf16.msra.mxu0 %v718_v27  ;;  %v784_v26 = vpack.c.bf16 %v387_v25, %v386_v24  ;;  %v389_v27 = vld [vmem:[#allocation10 + $0x38] sm:$0xff]  ;;  %v391_v30 = vld [vmem:[#allocation10 + $0x48] sm:$0xff]  ;;  %v394_v35 = vld [vmem:[#allocation10 + $0x60] sm:$0xff] }
  0x6e   :  { %720 = vmatprep.subr.bf16.mxu0 %v959_v0  ;;  %v790_v31 = vpack.c.bf16 %v391_v30, %v390_v29  ;;  %v494_v38 = vld [vmem:[%s1153_s4] ss:$0 sm:$0xff]  ;;  %v396_v43 = vld [vmem:[#allocation10 + $0x70] sm:$0xff] }
  0x6f   :  { %743 = vmatpush3.bf16.msra.mxu1 %v742_v36  ;;  %v395_v36 = vld [vmem:[#allocation10 + $0x68] sm:$0xff]  ;;  %v397_v44 = vld [vmem:[#allocation10 + $0x78] sm:$0xff] }
  0x70   :  { %744 = vmatprep.subr.bf16.mxu1 %v959_v0  ;;  %v796_v37 = vpack.c.bf16 %v395_v36, %v394_v35 }
  0x71   :  { %722 = vmatpush3.bf16.msra.mxu0 %v721_v33  ;;  %v393_v33 = vld [vmem:[#allocation10 + $0x58] sm:$0xff] }
  0x72   :  { %723 = vmatprep.subr.bf16.mxu0 %v959_v0  ;;  %v793_v34 = vpack.c.bf16 %v393_v33, %v392_v32 }
  0x73   :  { %746 = vmatpush3.bf16.msra.mxu1 %v745_v42 }
  0x74   :  { %747 = vmatprep.subr.bf16.mxu1 %v959_v0 }
  0x75   :  { %725 = vmatpush3.bf16.msra.mxu0 %v724_v39 }
  0x76   :  { %726 = vmatprep.subr.bf16.mxu0 %v959_v0 }
  0x77   :  { %749 = vmatpush3.bf16.msra.mxu1 %v748_v46  ;;  %v495_v46 = vld [vmem:[%s1155_s6] ss:$0 sm:$0xff] }
  0x78   :  { %750 = vmatprep.subr.bf16.mxu1 %v959_v0 }
  0x79   :  { %728 = vmatpush3.bf16.msra.mxu0 %v727_v45  ;;  %v799_v45 = vpack.c.bf16 %v397_v44, %v396_v43 }
  0x7a   :  { %753 = vmatprep.subr.bf16.mxu0 %v959_v0 }
  0x7b   :  { %752 = vmatpush3.bf16.msra.mxu1 %v751_v50  ;;  %v496_v50 = vld [vmem:[%s1157_s8] ss:$0 sm:$0xff] }
  0x7c   :  { %598 = vmatmul.mubr.f32.vlgmr.msra.gmra.mrb[0].mxu0 %v99_v47  ;;  %777 = vmatprep.subr.bf16.mxu1 %v959_v0 }
  0x7d   :  { %667 = vmatprep.mubr.msk.f32.mxu0 %vm960_vm0, %v961_v1  ;;  %755 = vmatpush3.bf16.msra.mxu0 %v754_v54 }
  0x7e   :  { %756 = vmatprep.subr.bf16.mxu0 %v959_v0 }
  0x81   :  { %758 = vmatpush3.bf16.msra.mxu0 %v757_v56 }
  0x82   :  { %759 = vmatprep.subr.bf16.mxu0 %v959_v0 }
  0x85   :  { %761 = vmatpush3.bf16.msra.mxu0 %v760_v59 }
  0x86   :  { %762 = vmatprep.subr.bf16.mxu0 %v959_v0 }
  0x89   :  { %764 = vmatpush3.bf16.msra.mxu0 %v763_v62 }
  0x8a   :  { %765 = vmatprep.subr.bf16.mxu0 %v959_v0 }
  0x8d   :  { %767 = vmatpush3.bf16.msra.mxu0 %v766_v3 }
  0x8e   :  { %768 = vmatprep.subr.bf16.mxu0 %v959_v0 }
  0x91   :  { %770 = vmatpush3.bf16.msra.mxu0 %v769_v6 }
  0x92   :  { %771 = vmatprep.subr.bf16.mxu0 %v959_v0 }
  0x95   :  { %773 = vmatpush3.bf16.msra.mxu0 %v772_v9 }
  0x96   :  { %774 = vmatprep.subr.bf16.mxu0 %v959_v0 }
  0x99   :  { %776 = vmatpush3.bf16.msra.mxu0 %v775_v17 }
 0x14f   :  { %v189_v11 = vpop.f32.mrb[0].mxu0 }
 0x150   :  { %v190_v12 = vadd.f32 %v493_v10, %v189_v11  ;;  %v599_v13 = vpop.f32.mrb[1].mxu0 }
 0x152   :  { %v193_v14 = vmax.f32 %v190_v12, 0.0 }
 0x154   :  { %633 = vmatmul.mubr.f32.vlgmr.msra.gmra.mrb[0].mxu1 %v193_v14 }
 0x155   :  { %702 = vmatprep.mubr.msk.f32.mxu1 %vm960_vm0, %v961_v1  ;;  %779 = vmatpush3.bf16.msra.mxu1 %v778_v21  ;;  %v388_v1 = vld [vmem:[#allocation10 + $0x30] sm:$0xff] }
 0x156   :  { %780 = vmatprep.subr.bf16.mxu1 %v959_v0  ;;  %v787_v28 = vpack.c.bf16 %v389_v27, %v388_v1 }
 0x159   :  { %782 = vmatpush3.bf16.msra.mxu1 %v781_v23 }
 0x15a   :  { %783 = vmatprep.subr.bf16.mxu1 %v959_v0 }
 0x15d   :  { %785 = vmatpush3.bf16.msra.mxu1 %v784_v26 }
 0x15e   :  { %786 = vmatprep.subr.bf16.mxu1 %v959_v0 }
 0x161   :  { %788 = vmatpush3.bf16.msra.mxu1 %v787_v28 }
 0x162   :  { %789 = vmatprep.subr.bf16.mxu1 %v959_v0 }
 0x165   :  { %791 = vmatpush3.bf16.msra.mxu1 %v790_v31 }
 0x166   :  { %792 = vmatprep.subr.bf16.mxu1 %v959_v0 }
 0x169   :  { %794 = vmatpush3.bf16.msra.mxu1 %v793_v34 }
 0x16a   :  { %795 = vmatprep.subr.bf16.mxu1 %v959_v0 }
 0x16d   :  { %797 = vmatpush3.bf16.msra.mxu1 %v796_v37 }
 0x16e   :  { %798 = vmatprep.subr.bf16.mxu1 %v959_v0 }
 0x171   :  { %800 = vmatpush3.bf16.msra.mxu1 %v799_v45 }
 0x227   :  { %v283_v39 = vpop.f32.mrb[0].mxu1 }
 0x228   :  { %v284_v40 = vadd.f32 %v494_v38, %v283_v39  ;;  %v634_v41 = vpop.f32.mrb[1].mxu1 }
 0x22a   :  { %v287_v42 = vmax.f32 %v284_v40, 0.0 }
 0x22c   :  { %668 = vmatmul.mubr.f32.vlgmr.msra.gmra.mrb[2].mxu0 %v287_v42 }
 0x2ff   :  { %v377_v47 = vpop.f32.mrb[2].mxu0 }
 0x300   :  { %v378_v48 = vadd.f32 %v495_v46, %v377_v47  ;;  %v669_v0 = vpop.f32.mrb[3].mxu0 }
 0x302   :  { %v381_v49 = vmax.f32 %v378_v48, 0.0 }
 0x304   :  { %703 = vmatmul.mubr.f32.vlgmr.msra.gmra.mrb[2].mxu1 %v381_v49 }
 0x3d7   :  { %v471_v51 = vpop.f32.mrb[2].mxu1 }
 0x3d8   :  { %v472_v52 = vadd.f32 %v496_v50, %v471_v51  ;;  %v704_v53 = vpop.f32.mrb[3].mxu1 }
 0x3da   :  { %475 = vst [vmem:[#allocation11] sm:$0xff] %v472_v52 }
 0x3db   :  { %933 = shalt.err (!%p930_p2)
}
 0x3dc   :  { %s934_s10 = scalar_lea.hbm %s1158_s9, 128 }
 0x3dd   :  { %p935_p3 = scmp.ne.s32.totalorder %s1158_s9, %s934_s10  ;;  %p938_p4 = scmp.lt.u32.totalorder %s934_s10, %s1158_s9 }
 0x3df   :  { %p940_p5 = pnand %p938_p4, %p935_p3 }
 0x3e1   :  { %943 = shalt.err (!%p940_p5)
}
 0x3e2   :  { %485 = dma.vmem_to_hbm [thread:$0]  %s483_s12, 128, %s1158_s9, [#allocation4]  }
 0x3e3   :  { %950 = dma.done.wait [#allocation4], 128  }
 0x3e4   :  { %951 = vsyncadd [#allocation4], 4294967168 }
 0x3e5   :  { %489 = vsyncpa [#allocation3], 1 }
 0x3e6   :  { %490 = vsyncpa [#allocation6], 1 }
 0x3e7   :  { %491 = vsyncpa [#allocation9], 1 }
 0x3e8   :  { %492 = vsyncpa [#allocation4], 1 }

</bundles_post_ra>
